<compile_context>
chip_gen: v7x
topology: tpu7x:2x2x1
jax: 0.10.0
libtpu: 0.0.40
codegen_flags: <defaults>
</compile_context>

<pallas_src>
import functools

import jax
import jax.numpy as jnp
from jax.experimental import pallas as pl
from jax.experimental.pallas import tpu as pltpu

LANE = 128  # TPU lane width


def _round_up(n, m):
    return ((n + m - 1) // m) * m


def _pad2d(a, rows, cols, dtype):
    out = jnp.zeros((rows, cols), dtype=dtype)
    return out.at[: a.shape[0], : a.shape[1]].set(a.astype(dtype))


# --------------------------------------------------------------------------- #
# Kernel
# --------------------------------------------------------------------------- #
def _classifier_kernel(x_ref, w1_ref, b1_ref, w2_ref, b2_ref, w3_ref, b3_ref,
                       o_ref):
    # Fused 3-layer MLP on one batch tile: three MXU matmuls (bf16 operands,
    # f32 accumulation) with f32 bias-add + sigmoid epilogues (EUP) between.
    x = x_ref[...].astype(jnp.bfloat16)                    # in-kernel cast; x
                                                           # stays f32 in HBM
    h1 = jnp.dot(x, w1_ref[...], preferred_element_type=jnp.float32)
    h1 = jax.nn.sigmoid(h1 + b1_ref[...]).astype(jnp.bfloat16)

    h2 = jnp.dot(h1, w2_ref[...], preferred_element_type=jnp.float32)
    h2 = jax.nn.sigmoid(h2 + b2_ref[...]).astype(jnp.bfloat16)

    out = jnp.dot(h2, w3_ref[...], preferred_element_type=jnp.float32)
    o_ref[...] = (out + b3_ref[...]).astype(o_ref.dtype)   # (TB, 10) store


# --------------------------------------------------------------------------- #
# One-time parameter preparation (pad hidden dim, cast to bf16)
# --------------------------------------------------------------------------- #
def prepare_params(params):
    """Pad the hidden dimension to a lane multiple and cast weights to bf16
    ONCE; reuse the result across every forward call."""
    w1, b1 = params["w1"], params["b1"]
    w2, b2 = params["w2"], params["b2"]
    w3, b3 = params["w3"], params["b3"]
    Z, H = w1.shape
    OUT = w3.shape[1]
    Hp = _round_up(H, LANE)

    return {
        # Padded weight rows are zero so the 0.5 values of padded hidden lanes
        # never leak into real outputs.
        "w1": _pad2d(w1, Z, Hp, jnp.bfloat16),
        "b1": _pad2d(b1, 1, Hp, jnp.float32),
        "w2": _pad2d(w2, Hp, Hp, jnp.bfloat16),
        "b2": _pad2d(b2, 1, Hp, jnp.float32),
        "w3": _pad2d(w3, Hp, OUT, jnp.bfloat16),
        "b3": b3.astype(jnp.float32).reshape(1, OUT),
    }


def _choose_tiles(batch, tb):
    tb = _round_up(tb, 8)
    b8 = _round_up(batch, 8)
    TB = min(tb, b8)
    # Keep >= 2 grid tiles once the batch is large enough: lets the "parallel"
    # axis shard across both v7x TensorCores and gives the pipeliner overlap.
    if TB == b8 and b8 >= 512:
        TB = _round_up((b8 + 1) // 2, 8)
    Bp = _round_up(batch, TB)
    return TB, Bp, Bp // TB


# --------------------------------------------------------------------------- #
# Forward
# --------------------------------------------------------------------------- #
@functools.partial(jax.jit, static_argnames=("tb", "force_pallas"))
def classifier_forward(x, prepared, *, tb=1024, force_pallas=False):
    """x: [B, z_dim] float32. prepared: output of prepare_params()."""
    w1, b1 = prepared["w1"], prepared["b1"]
    w2, b2 = prepared["w2"], prepared["b2"]
    w3, b3 = prepared["w3"], prepared["b3"]

    B, Z = x.shape
    Hp = w1.shape[1]
    OUT = w3.shape[1]

    TB, Bp, n_tiles = _choose_tiles(B, tb)

    if n_tiles == 1 and not force_pallas:
        # Small-batch fast path: one fused XLA dot chain, no pad / pallas_call
        # fixed cost. Same bf16-operand / f32-accumulate numerics as the kernel.
        h = jax.nn.sigmoid(
            jnp.dot(x.astype(jnp.bfloat16), w1,
                    preferred_element_type=jnp.float32) + b1)
        h = jax.nn.sigmoid(
            jnp.dot(h.astype(jnp.bfloat16), w2,
                    preferred_element_type=jnp.float32) + b2)
        return jnp.dot(h.astype(jnp.bfloat16), w3,
                       preferred_element_type=jnp.float32) + b3

    # Row-pad the batch only when necessary (no extra HBM pass when B % TB == 0).
    xp = x if Bp == B else jnp.zeros((Bp, Z), x.dtype).at[:B].set(x)

    # Weights/biases: constant index_map -> VMEM-resident across grid steps.
    # (pl.Buffered(1) would save a little VMEM here, but the weights are tiny.)
    def resident(a):
        return pl.BlockSpec(a.shape, lambda i: (0, 0), memory_space=pltpu.VMEM)

    x_spec = pl.BlockSpec((TB, Z), lambda i: (i, 0), memory_space=pltpu.VMEM)
    o_spec = pl.BlockSpec((TB, OUT), lambda i: (i, 0), memory_space=pltpu.VMEM)

    flops = 2 * Bp * (Z * Hp + Hp * Hp + Hp * OUT)
    bytes_accessed = (
        xp.size * xp.dtype.itemsize
        + sum(a.size * a.dtype.itemsize for a in (w1, b1, w2, b2, w3, b3))
        + Bp * OUT * 4)
    cost = pl.CostEstimate(flops=flops,
                           transcendentals=2 * Bp * Hp,  # two sigmoid layers
                           bytes_accessed=bytes_accessed)

    out = pl.pallas_call(
        _classifier_kernel,
        out_shape=jax.ShapeDtypeStruct((Bp, OUT), jnp.float32),
        grid=(n_tiles,),
        in_specs=[x_spec, resident(w1), resident(b1), resident(w2),
                  resident(b2), resident(w3), resident(b3)],
        out_specs=o_spec,
        compiler_params=pltpu.CompilerParams(
            dimension_semantics=("parallel",)),
        cost_estimate=cost,
    )(xp, w1, b1, w2, b2, w3, b3)

    # NOTE: rows >= B of the padded output are garbage and must never be
    # consumed; they are sliced off here.
    return out if Bp == B else out[:B]


# --------------------------------------------------------------------------- #
# Init + reference
# --------------------------------------------------------------------------- #
def init_params(key, z_dim, hidden, out_dim=10):
    """Deterministic init mimicking PyTorch's default Linear init
    (uniform(-1/sqrt(fan_in), 1/sqrt(fan_in)))."""
    keys = jax.random.split(key, 6)

    def linear(kw, kb, fan_in, fan_out):
        bound = 1.0 / jnp.sqrt(jnp.float32(fan_in))
        w = jax.random.uniform(kw, (fan_in, fan_out), jnp.float32,
                               minval=-bound, maxval=bound)
        b = jax.random.uniform(kb, (1, fan_out), jnp.float32,
                               minval=-bound, maxval=bound)
        return w, b

    w1, b1 = linear(keys[0], keys[1], z_dim, hidden)
    w2, b2 = linear(keys[2], keys[3], hidden, hidden)
    w3, b3 = linear(keys[4], keys[5], hidden, out_dim)
    return {"w1": w1, "b1": b1, "w2": w2, "b2": b2, "w3": w3, "b3": b3}


def classifier_reference(x, params):
    """Pure-JAX reference matching the kernel's bf16-operand / f32-accumulate
    numerics (operands rounded to bf16, accumulation in f32)."""
    f = lambda a: a.astype(jnp.bfloat16)
    h = jax.nn.sigmoid(jnp.dot(f(x), f(params["w1"]),
                               preferred_element_type=jnp.float32)
                       + params["b1"])
    h = jax.nn.sigmoid(jnp.dot(f(h), f(params["w2"]),
                               preferred_element_type=jnp.float32)
                       + params["b2"])
    return jnp.dot(f(h), f(params["w3"]),
                   preferred_element_type=jnp.float32) + params["b3"]


# --------------------------------------------------------------------------- #
# Test
# --------------------------------------------------------------------------- #
if __name__ == "__main__":
    key = jax.random.PRNGKey(0)
    k_x1, k_x2, k_p = jax.random.split(key, 3)

    Z_DIM, HIDDEN = 32, 64
    params = init_params(k_p, Z_DIM, HIDDEN)
    prepared = prepare_params(params)

    # 1) Pallas path: >= 2 grid tiles, non-multiple batch exercises row padding.
    B_BIG = 500
    x_big = jax.random.normal(k_x1, (B_BIG, Z_DIM), dtype=jnp.float32)
    out_big = jax.block_until_ready(classifier_forward(x_big, prepared, tb=256))
    ref_big = classifier_reference(x_big, params)
    assert out_big.shape == (B_BIG, 10), out_big.shape
    assert jnp.allclose(out_big, ref_big, atol=2e-3, rtol=2e-3), \
        float(jnp.max(jnp.abs(out_big - ref_big)))

    # 2) Small batch: default fast path (no pallas_call).
    B_SMALL = 8
    x_small = jax.random.normal(k_x2, (B_SMALL, Z_DIM), dtype=jnp.float32)
    out_small = jax.block_until_ready(classifier_forward(x_small, prepared))
    ref_small = classifier_reference(x_small, params)
    assert out_small.shape == (B_SMALL, 10), out_small.shape
    assert jnp.allclose(out_small, ref_small, atol=2e-3, rtol=2e-3), \
        float(jnp.max(jnp.abs(out_small - ref_small)))

    # 3) Single-tile Pallas path also works when forced.
    out_forced = jax.block_until_ready(
        classifier_forward(x_small, prepared, force_pallas=True))
    assert jnp.allclose(out_forced, ref_small, atol=2e-3, rtol=2e-3), \
        float(jnp.max(jnp.abs(out_forced - ref_small)))

    print("KERNEL_OK")
</pallas_src>

<mosaic_0001>
module attributes {stable_mosaic.version = 11 : i64} {
  func.func @_classifier_kernel(%arg0: i32, %arg1: memref<256x32xf32, #tpu.memory_space<vmem>>, %arg2: memref<32x128xbf16, #tpu.memory_space<vmem>>, %arg3: memref<1x128xf32, #tpu.memory_space<vmem>>, %arg4: memref<128x128xbf16, #tpu.memory_space<vmem>>, %arg5: memref<1x128xf32, #tpu.memory_space<vmem>>, %arg6: memref<128x10xbf16, #tpu.memory_space<vmem>>, %arg7: memref<1x10xf32, #tpu.memory_space<vmem>>, %arg8: memref<256x10xf32, #tpu.memory_space<vmem>>) attributes {dimension_semantics = [#tpu.dimension_semantics<parallel>], iteration_bounds = array<i64: 2>, scalar_prefetch = 0 : i64, scratch_operands = 0 : i64, tpu.core_type = #tpu.core_type<tc>, window_params = [{transform_indices = @transform_0, window_bounds = array<i64: 256, 32>}, {pipeline_mode = #tpu.pipeline_mode<synchronous>, transform_indices = @transform_1, window_bounds = array<i64: 32, 128>}, {pipeline_mode = #tpu.pipeline_mode<synchronous>, transform_indices = @transform_2, window_bounds = array<i64: 1, 128>}, {pipeline_mode = #tpu.pipeline_mode<synchronous>, transform_indices = @transform_3, window_bounds = array<i64: 128, 128>}, {pipeline_mode = #tpu.pipeline_mode<synchronous>, transform_indices = @transform_4, window_bounds = array<i64: 1, 128>}, {pipeline_mode = #tpu.pipeline_mode<synchronous>, transform_indices = @transform_5, window_bounds = array<i64: 128, 10>}, {pipeline_mode = #tpu.pipeline_mode<synchronous>, transform_indices = @transform_6, window_bounds = array<i64: 1, 10>}, {transform_indices = @transform_7, window_bounds = array<i64: 256, 10>}]} {
    %c0 = arith.constant 0 : index
    %c0_0 = arith.constant 0 : index
    %0 = vector.load %arg1[%c0, %c0_0] : memref<256x32xf32, #tpu.memory_space<vmem>>, vector<256x32xf32>
    %1 = arith.truncf %0 : vector<256x32xf32> to vector<256x32xbf16>
    %c0_1 = arith.constant 0 : index
    %c0_2 = arith.constant 0 : index
    %2 = vector.load %arg2[%c0_1, %c0_2] : memref<32x128xbf16, #tpu.memory_space<vmem>>, vector<32x128xbf16>
    %cst = arith.constant dense<0.000000e+00> : vector<256x128xf32>
    %3 = tpu.matmul %1, %2, %cst {dimension_numbers = #tpu.dot_dimension_numbers<[1], [0], [0], [1], [0, 0, 1, 1], [], []>} : vector<256x32xbf16>, vector<32x128xbf16>, vector<256x128xf32> -> vector<256x128xf32>
    %c0_3 = arith.constant 0 : index
    %c0_4 = arith.constant 0 : index
    %4 = vector.load %arg3[%c0_3, %c0_4] : memref<1x128xf32, #tpu.memory_space<vmem>>, vector<1x128xf32>
    %5 = vector.broadcast %4 : vector<1x128xf32> to vector<256x128xf32>
    %6 = arith.addf %3, %5 : vector<256x128xf32>
    %7 = arith.negf %6 : vector<256x128xf32>
    %8 = math.exp %7 : vector<256x128xf32>
    %cst_5 = arith.constant 1.000000e+00 : f32
    %9 = vector.broadcast %cst_5 : f32 to vector<256x128xf32>
    %10 = arith.addf %9, %8 : vector<256x128xf32>
    %11 = arith.divf %9, %10 : vector<256x128xf32>
    %12 = arith.truncf %11 : vector<256x128xf32> to vector<256x128xbf16>
    %c0_6 = arith.constant 0 : index
    %c0_7 = arith.constant 0 : index
    %13 = vector.load %arg4[%c0_6, %c0_7] : memref<128x128xbf16, #tpu.memory_space<vmem>>, vector<128x128xbf16>
    %cst_8 = arith.constant dense<0.000000e+00> : vector<256x128xf32>
    %14 = tpu.matmul %12, %13, %cst_8 {dimension_numbers = #tpu.dot_dimension_numbers<[1], [0], [0], [1], [0, 0, 1, 1], [], []>} : vector<256x128xbf16>, vector<128x128xbf16>, vector<256x128xf32> -> vector<256x128xf32>
    %c0_9 = arith.constant 0 : index
    %c0_10 = arith.constant 0 : index
    %15 = vector.load %arg5[%c0_9, %c0_10] : memref<1x128xf32, #tpu.memory_space<vmem>>, vector<1x128xf32>
    %16 = vector.broadcast %15 : vector<1x128xf32> to vector<256x128xf32>
    %17 = arith.addf %14, %16 : vector<256x128xf32>
    %18 = arith.negf %17 : vector<256x128xf32>
    %19 = math.exp %18 : vector<256x128xf32>
    %cst_11 = arith.constant 1.000000e+00 : f32
    %20 = vector.broadcast %cst_11 : f32 to vector<256x128xf32>
    %21 = arith.addf %20, %19 : vector<256x128xf32>
    %22 = arith.divf %20, %21 : vector<256x128xf32>
    %23 = arith.truncf %22 : vector<256x128xf32> to vector<256x128xbf16>
    %c0_12 = arith.constant 0 : index
    %c0_13 = arith.constant 0 : index
    %24 = vector.load %arg6[%c0_12, %c0_13] : memref<128x10xbf16, #tpu.memory_space<vmem>>, vector<128x10xbf16>
    %cst_14 = arith.constant dense<0.000000e+00> : vector<256x10xf32>
    %25 = tpu.matmul %23, %24, %cst_14 {dimension_numbers = #tpu.dot_dimension_numbers<[1], [0], [0], [1], [0, 0, 1, 1], [], []>} : vector<256x128xbf16>, vector<128x10xbf16>, vector<256x10xf32> -> vector<256x10xf32>
    %c0_15 = arith.constant 0 : index
    %c0_16 = arith.constant 0 : index
    %26 = vector.load %arg7[%c0_15, %c0_16] : memref<1x10xf32, #tpu.memory_space<vmem>>, vector<1x10xf32>
    %27 = vector.broadcast %26 : vector<1x10xf32> to vector<256x10xf32>
    %28 = arith.addf %25, %27 : vector<256x10xf32>
    %c0_17 = arith.constant 0 : index
    %c0_18 = arith.constant 0 : index
    %29 = vector.load %arg8[%c0_17, %c0_18] : memref<256x10xf32, #tpu.memory_space<vmem>>, vector<256x10xf32>
    tpu.vector_store %arg8[%c0_17, %c0_18], %28 {strides = array<i32>} : memref<256x10xf32, #tpu.memory_space<vmem>>, vector<256x10xf32>,
    return
  }
  func.func @transform_0(%arg0: i32) -> (i32, i32) {
    %c0_i32 = arith.constant 0 : i32
    %c0_i32_0 = arith.constant 0 : i32
    return %arg0, %c0_i32 : i32, i32
  }
  func.func @transform_1(%arg0: i32) -> (i32, i32) {
    %c0_i32 = arith.constant 0 : i32
    %c0_i32_0 = arith.constant 0 : i32
    %c0_i32_1 = arith.constant 0 : i32
    return %c0_i32, %c0_i32_0 : i32, i32
  }
  func.func @transform_2(%arg0: i32) -> (i32, i32) {
    %c0_i32 = arith.constant 0 : i32
    %c0_i32_0 = arith.constant 0 : i32
    %c0_i32_1 = arith.constant 0 : i32
    return %c0_i32, %c0_i32_0 : i32, i32
  }
  func.func @transform_3(%arg0: i32) -> (i32, i32) {
    %c0_i32 = arith.constant 0 : i32
    %c0_i32_0 = arith.constant 0 : i32
    %c0_i32_1 = arith.constant 0 : i32
    return %c0_i32, %c0_i32_0 : i32, i32
  }
  func.func @transform_4(%arg0: i32) -> (i32, i32) {
    %c0_i32 = arith.constant 0 : i32
    %c0_i32_0 = arith.constant 0 : i32
    %c0_i32_1 = arith.constant 0 : i32
    return %c0_i32, %c0_i32_0 : i32, i32
  }
  func.func @transform_5(%arg0: i32) -> (i32, i32) {
    %c0_i32 = arith.constant 0 : i32
    %c0_i32_0 = arith.constant 0 : i32
    %c0_i32_1 = arith.constant 0 : i32
    return %c0_i32, %c0_i32_0 : i32, i32
  }
  func.func @transform_6(%arg0: i32) -> (i32, i32) {
    %c0_i32 = arith.constant 0 : i32
    %c0_i32_0 = arith.constant 0 : i32
    %c0_i32_1 = arith.constant 0 : i32
    return %c0_i32, %c0_i32_0 : i32, i32
  }
  func.func @transform_7(%arg0: i32) -> (i32, i32) {
    %c0_i32 = arith.constant 0 : i32
    %c0_i32_0 = arith.constant 0 : i32
    return %arg0, %c0_i32 : i32, i32
  }
}

</mosaic_0001>

<bundles_post_ra>
// kernel: classifier_forward.1
= control target key start
LH: loop header
LB: loop body
LE: loop exit
PB: predicated region body
PF: predicated region fallthrough
CT: control target
= control target key end

     0   :  { %s2177_s24 = smov 0   ;;  %s2527_s0 = inlined_call_operand.vmem [shape: f32[512,32], index: 0, kind: input, shape index: {}]   ;;  %s2528_s1 = inlined_call_operand.vmem [shape: bf16[32,128], index: 1, kind: input, shape index: {}]   ;;  %s2529_s2 = inlined_call_operand.vmem [shape: f32[1,128], index: 2, kind: input, shape index: {}]   ;;  %s2530_s3 = inlined_call_operand.vmem [shape: bf16[128,128], index: 3, kind: input, shape index: {}]   ;;  %s2531_s4 = inlined_call_operand.vmem [shape: f32[1,128], index: 4, kind: input, shape index: {}]   ;;  %s2532_s5 = inlined_call_operand.vmem [shape: bf16[128,10], index: 5, kind: input, shape index: {}]   ;;  %s2533_s6 = inlined_call_operand.vmem [shape: f32[1,10], index: 6, kind: input, shape index: {}]   ;;  %s2534_s7 = inlined_call_operand.vmem [shape: f32[512,10], index: 7, kind: output, shape index: {}]  }
   0x1 LB: > { %s1533_s25 = sadd.s32 4294967295, %s2135_s24   ;;  %p1537_p0 = scmp.ge.s32.totalorder %s2135_s24, 1  ;;  %s2135_s24 = sphi %s2177_s24, %s17_s24  }
   0x2   : > { %p238_p1 = scmp.lt.s32.totalorder %s2135_s24, 3 }
   0x4   : > { %p239_p2 = pnand %p1537_p0, %p238_p1 }
   0x5   : > { %v1855_v0 = vld [vmem:[%s2528_s1] sm:$0xff] (!%p239_p2)   ;;  %s1538_s28 = sshll.u32 (!%p239_p2), %s1533_s25, 5  ;;  %v1856_v1 = vld [vmem:[%s2528_s1 + $0x8] sm:$0xff] (!%p239_p2)   ;;  %vm354_vm0 = vcmask (!%p239_p2), 261120   ;;  %v1859_v52 = vld [vmem:[%s2530_s3 + $0x10] sm:$0xff] (!%p239_p2)   ;;  %vm1444_vm1 = vcmask (!%p239_p2), 80896  }
   0x6   : > { %242 = sbr.rel (%p239_p2) target bundleno = 789 (0x315), region = 48  ;;  %p271_p3 = scmp.lt.s32.totalorder (!%p239_p2), %s1538_s28, 63  ;;  %1711 = vmatprep.subr.bf16.mxu0 (!%p239_p2), %v1855_v0  ;;  %1843 = vmatprep.subr.bf16.mxu1 (!%p239_p2), %v1855_v0  ;;  %v1857_v50 = vld [vmem:[%s2530_s3] sm:$0xff] (!%p239_p2)   ;;  %v1858_v51 = vld [vmem:[%s2530_s3 + $0x8] sm:$0xff] (!%p239_p2)   ;;  %v1860_v53 = vld [vmem:[%s2530_s3 + $0x18] sm:$0xff] (!%p239_p2)  }
   0x7   : > { %1712 = vmatpush3.bf16.msra.mxu0 (!%p239_p2), %v1855_v0  ;;  %1845 = vmatpush3.bf16.msra.mxu1 (!%p239_p2), %v1855_v0  ;;  %v1861_v54 = vld [vmem:[%s2530_s3 + $0x20] sm:$0xff] (!%p239_p2)   ;;  %v1862_v55 = vld [vmem:[%s2530_s3 + $0x28] sm:$0xff] (!%p239_p2)   ;;  %v1863_v56 = vld [vmem:[%s2530_s3 + $0x30] sm:$0xff] (!%p239_p2)  }
   0x8   : > { %1713 = vmatprep.subr.bf16.mxu0 (!%p239_p2), %v1856_v1  ;;  %1844 = vmatprep.subr.bf16.mxu1 (!%p239_p2), %v1856_v1  ;;  %v1864_v57 = vld [vmem:[%s2530_s3 + $0x38] sm:$0xff] (!%p239_p2)   ;;  %v2276_v58 = vld [vmem:[%s2529_s2] ss:$0 sm:$0xff] (!%p239_p2) }
   0xb   : > { %1714 = vmatpush3.bf16.msra.mxu0 (!%p239_p2), %v1856_v1  ;;  %1846 = vmatpush3.bf16.msra.mxu1 (!%p239_p2), %v1856_v1 }
   0xc   : > { %1747 = vmatprep.subr.bf16.mxu1 (!%p239_p2), %v1857_v50 }
   0xd   : > { %s2536_s28 = smov (!%p271_p3, %s1538_s28), 63 }
   0xe   : > { %s1539_s8 = sshll.u32 %s2536_s28, 3 }
   0xf   : > { %s2199_s11 = scalar_lea.vmem %s2527_s0, %s1539_s8  ;;  %s2426_s12 = scalar_lea.vmem %s2534_s7, %s1539_s8 }
  0x10   : > { %v283_v2 = vld [vmem:[%s2199_s11] sm:$0xff]  ;;  %v284_v3 = vld [vmem:[%s2199_s11 + $0x8] sm:$0xff]  ;;  %v285_v4 = vld [vmem:[%s2199_s11 + $0x10] sm:$0xff] }
  0x11   : > { %v315_v5 = vpack.c.bf16 %v284_v3, %v283_v2  ;;  %v286_v6 = vld [vmem:[%s2199_s11 + $0x18] sm:$0xff]  ;;  %v287_v7 = vld [vmem:[%s2199_s11 + $0x20] sm:$0xff]  ;;  %v288_v8 = vld [vmem:[%s2199_s11 + $0x28] sm:$0xff] }
  0x12   : > { %v316_v9 = vpack.c.bf16 %v286_v6, %v285_v4  ;;  %v317_v10 = vpack.c.bf16 %v288_v8, %v287_v7  ;;  %v289_v11 = vld [vmem:[%s2199_s11 + $0x30] sm:$0xff]  ;;  %v290_v12 = vld [vmem:[%s2199_s11 + $0x38] sm:$0xff]  ;;  %v291_v13 = vld [vmem:[%s2199_s11 + $0x40] sm:$0xff] }
  0x13   : > { %1715 = vmatprep.mubr.msk.bf16.mxu0 %vm354_vm0, %v315_v5  ;;  %v292_v14 = vld [vmem:[%s2199_s11 + $0x48] sm:$0xff]  ;;  %v299_v15 = vld [vmem:[%s2199_s11 + $0x80] sm:$0xff]  ;;  %v301_v18 = vld [vmem:[%s2199_s11 + $0x90] sm:$0xff]  ;;  %v318_v23 = vpack.c.bf16 %v290_v12, %v289_v11 }
  0x14   : > { %1716 = vmatmul.mubr.msk.bf16.vlgmr.msra.gmra.mrb[0].mxu0 %vm354_vm0, %v316_v9  ;;  %v300_v16 = vld [vmem:[%s2199_s11 + $0x88] sm:$0xff]  ;;  %v302_v19 = vld [vmem:[%s2199_s11 + $0x98] sm:$0xff]  ;;  %v303_v20 = vld [vmem:[%s2199_s11 + $0xa0] sm:$0xff]  ;;  %v319_v25 = vpack.c.bf16 %v292_v14, %v291_v13 }
  0x15   : > { %1719 = vmatprep.mubr.msk.bf16.mxu0 %vm354_vm0, %v317_v10  ;;  %v323_v17 = vpack.c.bf16 %v300_v16, %v299_v15  ;;  %v324_v21 = vpack.c.bf16 %v302_v19, %v301_v18  ;;  %v304_v22 = vld [vmem:[%s2199_s11 + $0xa8] sm:$0xff]  ;;  %v305_v26 = vld [vmem:[%s2199_s11 + $0xb0] sm:$0xff]  ;;  %v306_v27 = vld [vmem:[%s2199_s11 + $0xb8] sm:$0xff] }
  0x16   : > { %v325_v24 = vpack.c.bf16 %v304_v22, %v303_v20  ;;  %v307_v28 = vld [vmem:[%s2199_s11 + $0xc0] sm:$0xff]  ;;  %v308_v29 = vld [vmem:[%s2199_s11 + $0xc8] sm:$0xff]  ;;  %v293_v30 = vld [vmem:[%s2199_s11 + $0x50] sm:$0xff]  ;;  %v326_v34 = vpack.c.bf16 %v306_v27, %v305_v26 }
  0x17   : > { %1731 = vmatprep.mubr.msk.bf16.mxu1 %vm354_vm0, %v323_v17  ;;  %v294_v31 = vld [vmem:[%s2199_s11 + $0x58] sm:$0xff]  ;;  %v295_v32 = vld [vmem:[%s2199_s11 + $0x60] sm:$0xff]  ;;  %v296_v33 = vld [vmem:[%s2199_s11 + $0x68] sm:$0xff]  ;;  %v327_v35 = vpack.c.bf16 %v308_v29, %v307_v28 }
  0x18   : > { %1732 = vmatmul.mubr.msk.bf16.vlgmr.msra.gmra.mrb[0].mxu1 %vm354_vm0, %v324_v21  ;;  %v320_v36 = vpack.c.bf16 %v294_v31, %v293_v30  ;;  %v321_v37 = vpack.c.bf16 %v296_v33, %v295_v32  ;;  %v309_v38 = vld [vmem:[%s2199_s11 + $0xd0] sm:$0xff]  ;;  %v310_v39 = vld [vmem:[%s2199_s11 + $0xd8] sm:$0xff]  ;;  %v311_v40 = vld [vmem:[%s2199_s11 + $0xe0] sm:$0xff] }
  0x19   : > { %1735 = vmatprep.mubr.msk.bf16.mxu1 %vm354_vm0, %v325_v24  ;;  %v312_v41 = vld [vmem:[%s2199_s11 + $0xe8] sm:$0xff]  ;;  %v297_v42 = vld [vmem:[%s2199_s11 + $0x70] sm:$0xff]  ;;  %v298_v43 = vld [vmem:[%s2199_s11 + $0x78] sm:$0xff]  ;;  %v328_v44 = vpack.c.bf16 %v310_v39, %v309_v38  ;;  %1748 = vmatpush3.bf16.msra.mxu1 %v1857_v50 }
  0x1a   : > { %v329_v45 = vpack.c.bf16 %v312_v41, %v311_v40  ;;  %v322_v46 = vpack.c.bf16 %v298_v43, %v297_v42  ;;  %v313_v47 = vld [vmem:[%s2199_s11 + $0xf0] sm:$0xff]  ;;  %v314_v48 = vld [vmem:[%s2199_s11 + $0xf8] sm:$0xff]  ;;  %1749 = vmatprep.subr.bf16.mxu1 %v1858_v51 }
  0x1b   : > { %v330_v49 = vpack.c.bf16 %v314_v48, %v313_v47 }
  0x1c   : > { %1720 = vmatmul.mubr.msk.bf16.gmra.mrb[4].mxu0 %vm354_vm0, %v318_v23 }
  0x1d   : > { %1723 = vmatprep.mubr.msk.bf16.mxu0 %vm354_vm0, %v319_v25  ;;  %1750 = vmatpush3.bf16.msra.mxu1 %v1858_v51 }
  0x1e   : > { %1751 = vmatprep.subr.bf16.mxu1 %v1859_v52 }
  0x20   : > { %1736 = vmatmul.mubr.msk.bf16.gmra.mrb[4].mxu1 %vm354_vm0, %v326_v34 }
  0x21   : > { %1739 = vmatprep.mubr.msk.bf16.mxu1 %vm354_vm0, %v327_v35  ;;  %1752 = vmatpush3.bf16.msra.mxu1 %v1859_v52 }
  0x22   : > { %1753 = vmatprep.subr.bf16.mxu1 %v1860_v53 }
  0x24   : > { %1724 = vmatmul.mubr.msk.bf16.gmra.mrb[8].mxu0 %vm354_vm0, %v320_v36 }
  0x25   : > { %1727 = vmatprep.mubr.msk.bf16.mxu0 %vm354_vm0, %v321_v37  ;;  %1754 = vmatpush3.bf16.msra.mxu1 %v1860_v53 }
  0x26   : > { %1755 = vmatprep.subr.bf16.mxu1 %v1861_v54 }
  0x28   : > { %1740 = vmatmul.mubr.msk.bf16.gmra.mrb[8].mxu1 %vm354_vm0, %v328_v44 }
  0x29   : > { %1743 = vmatprep.mubr.msk.bf16.mxu1 %vm354_vm0, %v329_v45  ;;  %1756 = vmatpush3.bf16.msra.mxu1 %v1861_v54 }
  0x2a   : > { %1757 = vmatprep.subr.bf16.mxu1 %v1862_v55 }
  0x2c   : > { %1728 = vmatmul.mubr.msk.bf16.gmra.mrb[12].mxu0 %vm354_vm0, %v322_v46 }
  0x2d   : > { %1758 = vmatpush3.bf16.msra.mxu1 %v1862_v55 }
  0x2e   : > { %1759 = vmatprep.subr.bf16.mxu1 %v1863_v56 }
  0x30   : > { %1744 = vmatmul.mubr.msk.bf16.gmra.mrb[12].mxu1 %vm354_vm0, %v330_v49 }
  0x31   : > { %1760 = vmatpush3.bf16.msra.mxu1 %v1863_v56 }
  0x32   : > { %1761 = vmatprep.subr.bf16.mxu1 %v1864_v57 }
  0x35   : > { %1762 = vmatpush3.bf16.msra.mxu1 %v1864_v57 }
  0xe7   : > { %v1717_v59 = vpop.f32.mrb[0].mxu0 }
  0xe8   : > { %v446_v60 = vadd.f32 %v1717_v59, %v2276_v58  ;;  %v437_v61 = vpop.f32.mrb[1].mxu0 }
  0xe9   : > { %v438_v62 = vadd.f32 %v2276_v58, %v437_v61  ;;  %v1718_v63 = vpop.f32.mrb[2].mxu0 }
  0xea   : > { %v1563_v0 = vmul.f32 -1.442695, %v446_v60  ;;  %v449_v1 = vadd.f32 %v1718_v63, %v2276_v58  ;;  %v440_v2 = vpop.f32.mrb[3].mxu0 }
  0xeb   : > { %v1561_v3 = vmul.f32 -1.442695, %v438_v62  ;;  %v441_v4 = vadd.f32 %v2276_v58, %v440_v2  ;;  %v1733_v6 = vpop.f32.mrb[0].mxu1 }
  0xec   : > { %1873 = vpow2.f32 %v1563_v0  ;;  %v1564_v5 = vmul.f32 -1.442695, %v449_v1  ;;  %v510_v8 = vadd.f32 %v1733_v6, %v2276_v58  ;;  %v501_v9 = vpop.f32.mrb[1].mxu1 }
  0xed   : > { %1875 = vpow2.f32 %v1561_v3  ;;  %v1562_v7 = vmul.f32 -1.442695, %v441_v4  ;;  %v502_v10 = vadd.f32 %v2276_v58, %v501_v9  ;;  %v1734_v11 = vpop.f32.mrb[2].mxu1 }
  0xee   : > { %1877 = vpow2.f32 %v1564_v5  ;;  %v1579_v13 = vmul.f32 -1.442695, %v510_v8  ;;  %v513_v14 = vadd.f32 %v1734_v11, %v2276_v58  ;;  %v504_v15 = vpop.f32.mrb[3].mxu1 }
  0xef   : > { %1879 = vpow2.f32 %v1562_v7  ;;  %v1721_v12 = vpop.f32.mrb[4].mxu0  ;;  %v1577_v18 = vmul.f32 -1.442695, %v502_v10  ;;  %v505_v19 = vadd.f32 %v2276_v58, %v504_v15 }
  0xf0   : > { %v462_v16 = vadd.f32 %v1721_v12, %v2276_v58  ;;  %v453_v17 = vpop.f32.mrb[5].mxu0  ;;  %1881 = vpow2.f32 %v1579_v13  ;;  %v1580_v22 = vmul.f32 -1.442695, %v513_v14 }
  0xf1   : > { %v454_v20 = vadd.f32 %v2276_v58, %v453_v17  ;;  %v1722_v21 = vpop.f32.mrb[6].mxu0  ;;  %1883 = vpow2.f32 %v1577_v18  ;;  %v1578_v29 = vmul.f32 -1.442695, %v505_v19 }
  0xf2   : > { %v1567_v23 = vmul.f32 -1.442695, %v462_v16  ;;  %v465_v24 = vadd.f32 %v1722_v21, %v2276_v58  ;;  %v456_v25 = vpop.f32.mrb[7].mxu0  ;;  %1885 = vpow2.f32 %v1580_v22 }
  0xf3   : > { %v1565_v26 = vmul.f32 -1.442695, %v454_v20  ;;  %v457_v27 = vadd.f32 %v2276_v58, %v456_v25  ;;  %v2290_v30 = vpop.f32.mrb[4].mxu1 }
  0xf4   : > { %1887 = vpow2.f32 %v1567_v23  ;;  %v1568_v28 = vmul.f32 -1.442695, %v465_v24  ;;  %v2292_v32 = vpop.f32.mrb[5].mxu1 }
  0xf5   : > { %1889 = vpow2.f32 %v1565_v26  ;;  %v1566_v31 = vmul.f32 -1.442695, %v457_v27  ;;  %v2294_v34 = vpop.f32.mrb[6].mxu1 }
  0xf6   : > { %v1874_v33 = vpop.eup %1873  ;;  %1891 = vpow2.f32 %v1568_v28  ;;  %v2296_v38 = vpop.f32.mrb[7].mxu1 }
  0xf7   : > { %v1876_v35 = vpop.eup %1875  ;;  %v662_v36 = vadd.f32 1.0, %v1874_v33  ;;  %1893 = vpow2.f32 %v1566_v31  ;;  %v1725_v37 = vpop.f32.mrb[8].mxu0 }
  0xf8   : > { %v1878_v39 = vpop.eup %1877  ;;  %v660_v40 = vadd.f32 1.0, %v1876_v35  ;;  %v478_v41 = vadd.f32 %v1725_v37, %v2276_v58  ;;  %v469_v42 = vpop.f32.mrb[9].mxu0  ;;  %1895 = vpow2.f32 %v1578_v29 }
  0xf9   : > { %v1880_v43 = vpop.eup %1879  ;;  %1897 = vrcp.f32 %v662_v36  ;;  %v663_v44 = vadd.f32 1.0, %v1878_v39  ;;  %v470_v45 = vadd.f32 %v2276_v58, %v469_v42  ;;  %v1726_v46 = vpop.f32.mrb[10].mxu0 }
  0xfa   : > { %1899 = vrcp.f32 %v660_v40  ;;  %v661_v47 = vadd.f32 1.0, %v1880_v43  ;;  %v1571_v48 = vmul.f32 -1.442695, %v478_v41  ;;  %v481_v49 = vadd.f32 %v1726_v46, %v2276_v58  ;;  %v472_v50 = vpop.f32.mrb[11].mxu0  ;;  %v1882_v51 = vpop.eup %1881 }
  0xfb   : > { %1901 = vrcp.f32 %v663_v44  ;;  %v1569_v52 = vmul.f32 -1.442695, %v470_v45  ;;  %v473_v53 = vadd.f32 %v2276_v58, %v472_v50  ;;  %v2302_v54 = vpop.eup %1883  ;;  %v2304_v56 = vpop.f32.mrb[8].mxu1  ;;  %v678_v24 = vadd.f32 1.0, %v1882_v51 }
  0xfc   : > { %1903 = vrcp.f32 %v661_v47  ;;  %v1572_v55 = vmul.f32 -1.442695, %v481_v49  ;;  %v2306_v57 = vpop.eup %1885  ;;  %v2308_v60 = vpop.f32.mrb[9].mxu1  ;;  %v526_v40 = vadd.f32 %v2290_v30, %v2276_v58  ;;  %v676_v43 = vadd.f32 1.0, %v2302_v54 }
  0xfd   : > { %1905 = vpow2.f32 %v1571_v48  ;;  %v1570_v59 = vmul.f32 -1.442695, %v473_v53  ;;  %v2310_v62 = vpop.f32.mrb[10].mxu1  ;;  %v679_v46 = vadd.f32 1.0, %v2306_v57  ;;  %v518_v30 = vadd.f32 %v2276_v58, %v2292_v32 }
  0xfe   : > { %v1888_v61 = vpop.eup %1887  ;;  %1907 = vpow2.f32 %v1569_v52  ;;  %v2312_v2 = vpop.f32.mrb[11].mxu1  ;;  %v1583_v50 = vmul.f32 -1.442695, %v526_v40  ;;  %v529_v54 = vadd.f32 %v2294_v34, %v2276_v58  ;;  %v542_v32 = vadd.f32 %v2304_v56, %v2276_v58 }
  0xff   : > { %v1890_v63 = vpop.eup %1889  ;;  %v666_v0 = vadd.f32 1.0, %v1888_v61  ;;  %1909 = vpow2.f32 %v1572_v55  ;;  %v1729_v1 = vpop.f32.mrb[12].mxu0  ;;  %v521_v61 = vadd.f32 %v2276_v58, %v2296_v38  ;;  %v534_v34 = vadd.f32 %v2276_v58, %v2308_v60 }
 0x100   : > { %v1892_v3 = vpop.eup %1891  ;;  %v664_v4 = vadd.f32 1.0, %v1890_v63  ;;  %1911 = vpow2.f32 %v1570_v59  ;;  %v494_v5 = vadd.f32 %v1729_v1, %v2276_v58  ;;  %v485_v6 = vpop.f32.mrb[13].mxu0  ;;  %v1584_v38 = vmul.f32 -1.442695, %v529_v54 }
 0x101   : > { %v1894_v7 = vpop.eup %1893  ;;  %1913 = vrcp.f32 %v666_v0  ;;  %v667_v8 = vadd.f32 1.0, %v1892_v3  ;;  %v486_v9 = vadd.f32 %v2276_v58, %v485_v6  ;;  %v1730_v10 = vpop.f32.mrb[14].mxu0  ;;  %v537_v56 = vadd.f32 %v2276_v58, %v2312_v2 }
 0x102   : > { %v1896_v11 = vpop.eup %1895  ;;  %1915 = vrcp.f32 %v664_v4  ;;  %v665_v12 = vadd.f32 1.0, %v1894_v7  ;;  %v1575_v13 = vmul.f32 -1.442695, %v494_v5  ;;  %v497_v14 = vadd.f32 %v1730_v10, %v2276_v58  ;;  %v488_v15 = vpop.f32.mrb[15].mxu0 }
 0x103   : > { %v1898_v16 = vpop.eup %1897  ;;  %1917 = vrcp.f32 %v667_v8  ;;  %v1573_v17 = vmul.f32 -1.442695, %v486_v9  ;;  %v489_v18 = vadd.f32 %v2276_v58, %v488_v15  ;;  %v2318_v21 = vpop.f32.mrb[12].mxu1  ;;  %v677_v48 = vadd.f32 1.0, %v1896_v11 }
 0x104   : > { %v1900_v19 = vpop.eup %1899  ;;  %1919 = vrcp.f32 %v665_v12  ;;  %v1576_v20 = vmul.f32 -1.442695, %v497_v14  ;;  %v2320_v25 = vpop.f32.mrb[13].mxu1  ;;  %v1581_v4 = vmul.f32 -1.442695, %v518_v30  ;;  %v545_v7 = vadd.f32 %v2310_v62, %v2276_v58 }
 0x105   : > { %v1902_v22 = vpop.eup %1901  ;;  %1921 = vpow2.f32 %v1575_v13  ;;  %v1574_v23 = vmul.f32 -1.442695, %v489_v18  ;;  %v2322_v28 = vpop.f32.mrb[14].mxu1  ;;  %v1582_v9 = vmul.f32 -1.442695, %v521_v61  ;;  %v558_v60 = vadd.f32 %v2318_v21, %v2276_v58 }
 0x106   : > { %v1904_v26 = vpop.eup %1903  ;;  %1923 = vpow2.f32 %v1573_v17  ;;  %v757_v27 = vpack.c.bf16 %v1902_v22, %v1898_v16  ;;  %v2324_v33 = vpop.f32.mrb[15].mxu1  ;;  %v1587_v11 = vmul.f32 -1.442695, %v542_v32  ;;  %v1585_v13 = vmul.f32 -1.442695, %v534_v34 }
 0x107   : > { %v1906_v29 = vpop.eup %1905  ;;  %1925 = vpow2.f32 %v1576_v20  ;;  %v756_v31 = vpack.c.bf16 %v1904_v26, %v1900_v19  ;;  %v1588_v15 = vmul.f32 -1.442695, %v545_v7  ;;  %v550_v62 = vadd.f32 %v2276_v58, %v2320_v25 }
 0x108   : > { %v1908_v35 = vpop.eup %1907  ;;  %v670_v36 = vadd.f32 1.0, %v1906_v29  ;;  %1927 = vpow2.f32 %v1574_v23  ;;  %v1586_v18 = vmul.f32 -1.442695, %v537_v56  ;;  %v561_v19 = vadd.f32 %v2322_v28, %v2276_v58 }
 0x109   : > { %v1910_v37 = vpop.eup %1909  ;;  %v668_v39 = vadd.f32 1.0, %v1908_v35  ;;  %1929 = vrcp.f32 %v678_v24  ;;  %1763 = vmatprep.mubr.bf16.mxu1 %v756_v31  ;;  %v1591_v21 = vmul.f32 -1.442695, %v558_v60  ;;  %v553_v22 = vadd.f32 %v2276_v58, %v2324_v33 }
 0x10a   : > { %v1912_v41 = vpop.eup %1911  ;;  %1931 = vrcp.f32 %v670_v36  ;;  %v671_v42 = vadd.f32 1.0, %v1910_v37  ;;  %1764 = vmatmul.mubr.bf16.vlgmr.msra.gmra.mrb[16].mxu1 %v757_v27  ;;  %v1589_v25 = vmul.f32 -1.442695, %v550_v62  ;;  %v1592_v31 = vmul.f32 -1.442695, %v561_v19  ;;  %v1867_v62 = vld [vmem:[%s2532_s5 + $0x10] sm:$0xff]  }
 0x10b   : > { %v1914_v44 = vpop.eup %1913  ;;  %1933 = vrcp.f32 %v668_v39  ;;  %v669_v45 = vadd.f32 1.0, %v1912_v41  ;;  %v1590_v35 = vmul.f32 -1.442695, %v553_v22  ;;  %v1871_v19 = vld [vmem:[%s2532_s5 + $0x30] sm:$0xff]  }
 0x10c   : > { %v1916_v47 = vpop.eup %1915  ;;  %1935 = vrcp.f32 %v671_v42 }
 0x10d   : > { %v1918_v49 = vpop.eup %1917  ;;  %1937 = vrcp.f32 %v669_v45 }
 0x10e   : > { %v1920_v51 = vpop.eup %1919  ;;  %1939 = vrcp.f32 %v676_v43  ;;  %v759_v52 = vpack.c.bf16 %v1918_v49, %v1914_v44 }
 0x10f   : > { %v1922_v53 = vpop.eup %1921  ;;  %1941 = vrcp.f32 %v679_v46  ;;  %v758_v55 = vpack.c.bf16 %v1920_v51, %v1916_v47 }
 0x110   : > { %v1924_v59 = vpop.eup %1923  ;;  %v674_v57 = vadd.f32 1.0, %v1922_v53  ;;  %1943 = vrcp.f32 %v677_v48 }
 0x111   : > { %v1926_v63 = vpop.eup %1925  ;;  %v672_v0 = vadd.f32 1.0, %v1924_v59  ;;  %1945 = vpow2.f32 %v1583_v50  ;;  %1767 = vmatprep.mubr.bf16.mxu1 %v758_v55 }
 0x112   : > { %v1928_v1 = vpop.eup %1927  ;;  %1947 = vrcp.f32 %v674_v57  ;;  %v675_v3 = vadd.f32 1.0, %v1926_v63  ;;  %1768 = vmatmul.mubr.bf16.gmra.mrb[20].mxu1 %v759_v52 }
 0x113   : > { %v2340_v5 = vpop.eup %1929  ;;  %1949 = vrcp.f32 %v672_v0  ;;  %v673_v6 = vadd.f32 1.0, %v1928_v1 }
 0x114   : > { %v1932_v8 = vpop.eup %1931  ;;  %1951 = vrcp.f32 %v675_v3 }
 0x115   : > { %v1934_v10 = vpop.eup %1933  ;;  %1953 = vrcp.f32 %v673_v6 }
 0x116   : > { %v1936_v12 = vpop.eup %1935  ;;  %1955 = vpow2.f32 %v1581_v4 }
 0x117   : > { %v1938_v14 = vpop.eup %1937  ;;  %1957 = vpow2.f32 %v1584_v38  ;;  %v761_v16 = vpack.c.bf16 %v1936_v12, %v1932_v8 }
 0x118   : > { %v1940_v17 = vpop.eup %1939  ;;  %1959 = vpow2.f32 %v1582_v9  ;;  %v760_v2 = vpack.c.bf16 %v1938_v14, %v1934_v10 }
 0x119   : > { %v1942_v20 = vpop.eup %1941  ;;  %1961 = vpow2.f32 %v1587_v11 }
 0x11a   : > { %v1944_v23 = vpop.eup %1943  ;;  %1963 = vpow2.f32 %v1585_v13  ;;  %1771 = vmatprep.mubr.bf16.mxu1 %v760_v2  ;;  %v765_v24 = vpack.c.bf16 %v1942_v20, %v2340_v5  ;;  %v1870_v2 = vld [vmem:[%s2532_s5 + $0x28] sm:$0xff]   ;;  %v1872_v20 = vld [vmem:[%s2532_s5 + $0x38] sm:$0xff]  }
 0x11b   : > { %v1946_v26 = vpop.eup %1945  ;;  %1965 = vpow2.f32 %v1588_v15  ;;  %1772 = vmatmul.mubr.bf16.gmra.mrb[24].mxu1 %v761_v16  ;;  %v764_v27 = vpack.c.bf16 %v1944_v23, %v1940_v17  ;;  %v1865_v15 = vld [vmem:[%s2532_s5] sm:$0xff]   ;;  %v1866_v16 = vld [vmem:[%s2532_s5 + $0x8] sm:$0xff]   ;;  %v1868_v17 = vld [vmem:[%s2532_s5 + $0x18] sm:$0xff]  }
 0x11c   : > { %v1948_v29 = vpop.eup %1947  ;;  %1967 = vpow2.f32 %v1586_v18  ;;  %v682_v37 = vadd.f32 1.0, %v1946_v26  ;;  %1795 = vmatprep.subr.bf16.mxu0 %v1865_v15  ;;  %v1869_v18 = vld [vmem:[%s2532_s5 + $0x20] sm:$0xff]  }
 0x11d   : > { %v1950_v28 = vpop.eup %1949  ;;  %1969 = vpow2.f32 %v1591_v21  ;;  %1796 = vmatpush3.bf16.msra.mxu0 %v1865_v15  ;;  %v2382_v21 = vld [vmem:[%s2531_s4] ss:$0 sm:$0xff] }
 0x11e   : > { %v1952_v36 = vpop.eup %1951  ;;  %1971 = vpow2.f32 %v1589_v25  ;;  %1797 = vmatprep.subr.bf16.mxu0 %v1866_v16 }
 0x11f   : > { %v1954_v39 = vpop.eup %1953  ;;  %v763_v58 = vpack.c.bf16 %v1952_v36, %v1948_v29  ;;  %1973 = vpow2.f32 %v1592_v31 }
 0x120   : > { %v1956_v33 = vpop.eup %1955  ;;  %v762_v40 = vpack.c.bf16 %v1954_v39, %v1950_v28  ;;  %1975 = vpow2.f32 %v1590_v35 }
 0x121   : > { %v1958_v41 = vpop.eup %1957  ;;  %v680_v42 = vadd.f32 1.0, %v1956_v33  ;;  %1977 = vrcp.f32 %v682_v37  ;;  %1798 = vmatpush3.bf16.msra.mxu0 %v1866_v16 }
 0x122   : > { %v1960_v43 = vpop.eup %1959  ;;  %v683_v44 = vadd.f32 1.0, %v1958_v41  ;;  %1775 = vmatprep.mubr.bf16.mxu1 %v762_v40  ;;  %1799 = vmatprep.subr.bf16.mxu0 %v1867_v62 }
 0x123   : > { %v1962_v45 = vpop.eup %1961  ;;  %1979 = vrcp.f32 %v680_v42  ;;  %v681_v46 = vadd.f32 1.0, %v1960_v43  ;;  %1776 = vmatmul.mubr.bf16.gmra.mrb[28].mxu1 %v763_v58 }
 0x124   : > { %v1964_v47 = vpop.eup %1963  ;;  %1981 = vrcp.f32 %v683_v44  ;;  %v686_v48 = vadd.f32 1.0, %v1962_v45  ;;  %1779 = vmatprep.mubr.bf16.mxu1 %v764_v27 }
 0x125   : > { %v1966_v49 = vpop.eup %1965  ;;  %1983 = vrcp.f32 %v681_v46  ;;  %v684_v50 = vadd.f32 1.0, %v1964_v47  ;;  %1800 = vmatpush3.bf16.msra.mxu0 %v1867_v62 }
 0x126   : > { %v1968_v51 = vpop.eup %1967  ;;  %1985 = vrcp.f32 %v686_v48  ;;  %v687_v30 = vadd.f32 1.0, %v1966_v49  ;;  %1801 = vmatprep.subr.bf16.mxu0 %v1868_v17 }
 0x127   : > { %v1970_v52 = vpop.eup %1969  ;;  %1987 = vrcp.f32 %v684_v50  ;;  %v685_v53 = vadd.f32 1.0, %v1968_v51 }
 0x128   : > { %1989 = vrcp.f32 %v687_v30  ;;  %v690_v54 = vadd.f32 1.0, %v1970_v52  ;;  %v1972_v55 = vpop.eup %1971 }
 0x129   : > { %1991 = vrcp.f32 %v685_v53  ;;  %v1974_v59 = vpop.eup %1973  ;;  %v688_v57 = vadd.f32 1.0, %v1972_v55  ;;  %1802 = vmatpush3.bf16.msra.mxu0 %v1868_v17 }
 0x12a   : > { %v1976_v61 = vpop.eup %1975  ;;  %1993 = vrcp.f32 %v690_v54  ;;  %v691_v63 = vadd.f32 1.0, %v1974_v59  ;;  %1803 = vmatprep.subr.bf16.mxu0 %v1869_v18 }
 0x12b   : > { %1780 = vmatmul.mubr.bf16.gmra.mrb[32].mxu1 %v765_v24  ;;  %v1978_v0 = vpop.eup %1977  ;;  %1995 = vrcp.f32 %v688_v57  ;;  %v689_v32 = vadd.f32 1.0, %v1976_v61 }
 0x12c   : > { %1997 = vrcp.f32 %v691_v63 }
 0x12d   : > { %v1980_v1 = vpop.eup %1979  ;;  %1999 = vrcp.f32 %v689_v32  ;;  %1804 = vmatpush3.bf16.msra.mxu0 %v1869_v18 }
 0x12e   : > { %v1982_v3 = vpop.eup %1981  ;;  %1805 = vmatprep.subr.bf16.mxu0 %v1870_v2 }
 0x12f   : > { %v1984_v4 = vpop.eup %1983  ;;  %v767_v34 = vpack.c.bf16 %v1982_v3, %v1978_v0 }
 0x130   : > { %v1986_v5 = vpop.eup %1985  ;;  %v766_v6 = vpack.c.bf16 %v1984_v4, %v1980_v1 }
 0x131   : > { %v1988_v38 = vpop.eup %1987  ;;  %1806 = vmatpush3.bf16.msra.mxu0 %v1870_v2 }
 0x132   : > { %v1990_v7 = vpop.eup %1989  ;;  %1783 = vmatprep.mubr.bf16.mxu1 %v766_v6  ;;  %1807 = vmatprep.subr.bf16.mxu0 %v1871_v19 }
 0x133   : > { %v1992_v8 = vpop.eup %1991  ;;  %1784 = vmatmul.mubr.bf16.gmra.mrb[36].mxu1 %v767_v34  ;;  %v769_v9 = vpack.c.bf16 %v1990_v7, %v1986_v5 }
 0x134   : > { %v768_v56 = vpack.c.bf16 %v1992_v8, %v1988_v38  ;;  %v1994_v10 = vpop.eup %1993 }
 0x135   : > { %v1996_v11 = vpop.eup %1995  ;;  %1808 = vmatpush3.bf16.msra.mxu0 %v1871_v19 }
 0x136   : > { %1787 = vmatprep.mubr.bf16.mxu1 %v768_v56  ;;  %v1998_v60 = vpop.eup %1997  ;;  %1809 = vmatprep.subr.bf16.mxu0 %v1872_v20 }
 0x137   : > { %v2000_v12 = vpop.eup %1999  ;;  %v771_v13 = vpack.c.bf16 %v1998_v60, %v1994_v10 }
 0x138   : > { %v770_v14 = vpack.c.bf16 %v2000_v12, %v1996_v11 }
 0x139   : > { %1810 = vmatpush3.bf16.msra.mxu0 %v1872_v20 }
 0x13b   : > { %1788 = vmatmul.mubr.bf16.gmra.mrb[40].mxu1 %v769_v9 }
 0x13c   : > { %1791 = vmatprep.mubr.bf16.mxu1 %v770_v14 }
 0x143   : > { %1792 = vmatmul.mubr.bf16.gmra.mrb[44].mxu1 %v771_v13 }
 0x1dd   : > { %v1765_v22 = vpop.f32.mrb[16].mxu1 }
 0x1de   : > { %v886_v23 = vadd.f32 %v1765_v22, %v2382_v21  ;;  %v877_v24 = vpop.f32.mrb[17].mxu1 }
 0x1df   : > { %v878_v26 = vadd.f32 %v2382_v21, %v877_v24  ;;  %v1766_v25 = vpop.f32.mrb[18].mxu1 }
 0x1e0   : > { %v1604_v27 = vmul.f32 -1.442695, %v886_v23  ;;  %v889_v29 = vadd.f32 %v1766_v25, %v2382_v21  ;;  %v880_v31 = vpop.f32.mrb[19].mxu1 }
 0x1e1   : > { %v1602_v28 = vmul.f32 -1.442695, %v878_v26  ;;  %v881_v35 = vadd.f32 %v2382_v21, %v880_v31 }
 0x1e2   : > { %2001 = vpow2.f32 %v1604_v27  ;;  %v1605_v36 = vmul.f32 -1.442695, %v889_v29 }
 0x1e3   : > { %2003 = vpow2.f32 %v1602_v28  ;;  %v1603_v37 = vmul.f32 -1.442695, %v881_v35 }
 0x1e4   : > { %2005 = vpow2.f32 %v1605_v36 }
 0x1e5   : > { %2007 = vpow2.f32 %v1603_v37  ;;  %v1769_v39 = vpop.f32.mrb[20].mxu1 }
 0x1e6   : > { %v902_v58 = vadd.f32 %v1769_v39, %v2382_v21  ;;  %v893_v33 = vpop.f32.mrb[21].mxu1 }
 0x1e7   : > { %v894_v40 = vadd.f32 %v2382_v21, %v893_v33  ;;  %v1770_v41 = vpop.f32.mrb[22].mxu1 }
 0x1e8   : > { %v1608_v42 = vmul.f32 -1.442695, %v902_v58  ;;  %v905_v43 = vadd.f32 %v1770_v41, %v2382_v21  ;;  %v896_v44 = vpop.f32.mrb[23].mxu1 }
 0x1e9   : > { %v1606_v45 = vmul.f32 -1.442695, %v894_v40  ;;  %v897_v46 = vadd.f32 %v2382_v21, %v896_v44 }
 0x1ea   : > { %2009 = vpow2.f32 %v1608_v42  ;;  %v1609_v47 = vmul.f32 -1.442695, %v905_v43 }
 0x1eb   : > { %2011 = vpow2.f32 %v1606_v45  ;;  %v1607_v48 = vmul.f32 -1.442695, %v897_v46 }
 0x1ec   : > { %v2002_v49 = vpop.eup %2001  ;;  %2013 = vpow2.f32 %v1609_v47 }
 0x1ed   : > { %v2004_v50 = vpop.eup %2003  ;;  %v1102_v51 = vadd.f32 1.0, %v2002_v49  ;;  %2015 = vpow2.f32 %v1607_v48 }
 0x1ee   : > { %v2006_v30 = vpop.eup %2005  ;;  %v1100_v52 = vadd.f32 1.0, %v2004_v50  ;;  %v1773_v53 = vpop.f32.mrb[24].mxu1 }
 0x1ef   : > { %v2008_v54 = vpop.eup %2007  ;;  %2017 = vrcp.f32 %v1102_v51  ;;  %v1103_v55 = vadd.f32 1.0, %v2006_v30  ;;  %v918_v59 = vadd.f32 %v1773_v53, %v2382_v21  ;;  %v909_v57 = vpop.f32.mrb[25].mxu1 }
 0x1f0   : > { %2019 = vrcp.f32 %v1100_v52  ;;  %v1101_v61 = vadd.f32 1.0, %v2008_v54  ;;  %v910_v63 = vadd.f32 %v2382_v21, %v909_v57  ;;  %v1774_v0 = vpop.f32.mrb[26].mxu1 }
 0x1f1   : > { %2021 = vrcp.f32 %v1103_v55  ;;  %v1612_v32 = vmul.f32 -1.442695, %v918_v59  ;;  %v921_v1 = vadd.f32 %v1774_v0, %v2382_v21  ;;  %v912_v3 = vpop.f32.mrb[27].mxu1 }
 0x1f2   : > { %2023 = vrcp.f32 %v1101_v61  ;;  %v1610_v4 = vmul.f32 -1.442695, %v910_v63  ;;  %v913_v34 = vadd.f32 %v2382_v21, %v912_v3 }
 0x1f3   : > { %2025 = vpow2.f32 %v1612_v32  ;;  %v1613_v5 = vmul.f32 -1.442695, %v921_v1 }
 0x1f4   : > { %v2010_v6 = vpop.eup %2009  ;;  %2027 = vpow2.f32 %v1610_v4  ;;  %v1611_v38 = vmul.f32 -1.442695, %v913_v34 }
 0x1f5   : > { %v2012_v7 = vpop.eup %2011  ;;  %v1106_v8 = vadd.f32 1.0, %v2010_v6  ;;  %2029 = vpow2.f32 %v1613_v5 }
 0x1f6   : > { %v2014_v9 = vpop.eup %2013  ;;  %v1104_v56 = vadd.f32 1.0, %v2012_v7  ;;  %2031 = vpow2.f32 %v1611_v38  ;;  %v1777_v10 = vpop.f32.mrb[28].mxu1 }
 0x1f7   : > { %v2016_v11 = vpop.eup %2015  ;;  %2033 = vrcp.f32 %v1106_v8  ;;  %v1107_v60 = vadd.f32 1.0, %v2014_v9  ;;  %v934_v12 = vadd.f32 %v1777_v10, %v2382_v21  ;;  %v925_v13 = vpop.f32.mrb[29].mxu1 }
 0x1f8   : > { %2035 = vrcp.f32 %v1104_v56  ;;  %v1105_v14 = vadd.f32 1.0, %v2016_v11  ;;  %v926_v15 = vadd.f32 %v2382_v21, %v925_v13  ;;  %v1778_v16 = vpop.f32.mrb[30].mxu1 }
 0x1f9   : > { %v2018_v62 = vpop.eup %2017  ;;  %2037 = vrcp.f32 %v1107_v60  ;;  %v1616_v17 = vmul.f32 -1.442695, %v934_v12  ;;  %v937_v18 = vadd.f32 %v1778_v16, %v2382_v21  ;;  %v928_v2 = vpop.f32.mrb[31].mxu1 }
 0x1fa   : > { %v2020_v19 = vpop.eup %2019  ;;  %2039 = vrcp.f32 %v1105_v14  ;;  %v1614_v20 = vmul.f32 -1.442695, %v926_v15  ;;  %v929_v22 = vadd.f32 %v2382_v21, %v928_v2 }
 0x1fb   : > { %v2022_v23 = vpop.eup %2021  ;;  %2041 = vpow2.f32 %v1616_v17  ;;  %v1617_v24 = vmul.f32 -1.442695, %v937_v18 }
 0x1fc   : > { %v2024_v26 = vpop.eup %2023  ;;  %2043 = vpow2.f32 %v1614_v20  ;;  %v1615_v25 = vmul.f32 -1.442695, %v929_v22  ;;  %v1197_v27 = vpack.c.bf16 %v2022_v23, %v2018_v62 }
 0x1fd   : > { %v2026_v29 = vpop.eup %2025  ;;  %2045 = vpow2.f32 %v1617_v24  ;;  %v1196_v31 = vpack.c.bf16 %v2024_v26, %v2020_v19 }
 0x1fe   : > { %v2028_v28 = vpop.eup %2027  ;;  %v1110_v35 = vadd.f32 1.0, %v2026_v29  ;;  %2047 = vpow2.f32 %v1615_v25  ;;  %v1781_v36 = vpop.f32.mrb[32].mxu1 }
 0x1ff   : > { %v2030_v37 = vpop.eup %2029  ;;  %v1108_v39 = vadd.f32 1.0, %v2028_v28  ;;  %v950_v58 = vadd.f32 %v1781_v36, %v2382_v21  ;;  %v941_v33 = vpop.f32.mrb[33].mxu1  ;;  %1811 = vmatprep.mubr.bf16.mxu0 %v1196_v31 }
 0x200   : > { %v2032_v40 = vpop.eup %2031  ;;  %2049 = vrcp.f32 %v1110_v35  ;;  %v1111_v41 = vadd.f32 1.0, %v2030_v37  ;;  %v942_v42 = vadd.f32 %v2382_v21, %v941_v33  ;;  %v1782_v43 = vpop.f32.mrb[34].mxu1  ;;  %1812 = vmatmul.mubr.bf16.vlgmr.msra.gmra.mrb[16].mxu0 %v1197_v27 }
 0x201   : > { %v2034_v44 = vpop.eup %2033  ;;  %2051 = vrcp.f32 %v1108_v39  ;;  %v1109_v45 = vadd.f32 1.0, %v2032_v40  ;;  %v1620_v46 = vmul.f32 -1.442695, %v950_v58  ;;  %v953_v47 = vadd.f32 %v1782_v43, %v2382_v21  ;;  %v944_v48 = vpop.f32.mrb[35].mxu1 }
 0x202   : > { %v2036_v49 = vpop.eup %2035  ;;  %2053 = vrcp.f32 %v1111_v41  ;;  %v1618_v50 = vmul.f32 -1.442695, %v942_v42  ;;  %v945_v51 = vadd.f32 %v2382_v21, %v944_v48 }
 0x203   : > { %v2038_v30 = vpop.eup %2037  ;;  %2055 = vrcp.f32 %v1109_v45  ;;  %v1621_v52 = vmul.f32 -1.442695, %v953_v47 }
 0x204   : > { %v2040_v53 = vpop.eup %2039  ;;  %2057 = vpow2.f32 %v1620_v46  ;;  %v1619_v54 = vmul.f32 -1.442695, %v945_v51  ;;  %v1199_v55 = vpack.c.bf16 %v2038_v30, %v2034_v44 }
 0x205   : > { %v2042_v59 = vpop.eup %2041  ;;  %2059 = vpow2.f32 %v1618_v50  ;;  %v1198_v57 = vpack.c.bf16 %v2040_v53, %v2036_v49 }
 0x206   : > { %v2044_v61 = vpop.eup %2043  ;;  %v1114_v63 = vadd.f32 1.0, %v2042_v59  ;;  %2061 = vpow2.f32 %v1621_v52  ;;  %v1785_v0 = vpop.f32.mrb[36].mxu1 }
 0x207   : > { %v2046_v32 = vpop.eup %2045  ;;  %v1112_v1 = vadd.f32 1.0, %v2044_v61  ;;  %2063 = vpow2.f32 %v1619_v54  ;;  %v966_v3 = vadd.f32 %v1785_v0, %v2382_v21  ;;  %v957_v4 = vpop.f32.mrb[37].mxu1  ;;  %1815 = vmatprep.mubr.bf16.mxu0 %v1198_v57 }
 0x208   : > { %v2048_v34 = vpop.eup %2047  ;;  %2065 = vrcp.f32 %v1114_v63  ;;  %v1115_v5 = vadd.f32 1.0, %v2046_v32  ;;  %v958_v6 = vadd.f32 %v2382_v21, %v957_v4  ;;  %v1786_v38 = vpop.f32.mrb[38].mxu1  ;;  %1816 = vmatmul.mubr.bf16.gmra.mrb[20].mxu0 %v1199_v55 }
 0x209   : > { %2067 = vrcp.f32 %v1112_v1  ;;  %v1113_v7 = vadd.f32 1.0, %v2048_v34  ;;  %v1624_v8 = vmul.f32 -1.442695, %v966_v3  ;;  %v969_v9 = vadd.f32 %v1786_v38, %v2382_v21  ;;  %v960_v56 = vpop.f32.mrb[39].mxu1 }
 0x20a   : > { %v2050_v10 = vpop.eup %2049  ;;  %2069 = vrcp.f32 %v1115_v5  ;;  %v1622_v11 = vmul.f32 -1.442695, %v958_v6  ;;  %v961_v60 = vadd.f32 %v2382_v21, %v960_v56 }
 0x20b   : > { %v2052_v12 = vpop.eup %2051  ;;  %2071 = vrcp.f32 %v1113_v7  ;;  %v1625_v13 = vmul.f32 -1.442695, %v969_v9 }
 0x20c   : > { %v2054_v14 = vpop.eup %2053  ;;  %2073 = vpow2.f32 %v1624_v8  ;;  %v1623_v15 = vmul.f32 -1.442695, %v961_v60 }
 0x20d   : > { %v2056_v16 = vpop.eup %2055  ;;  %2075 = vpow2.f32 %v1622_v11  ;;  %v1201_v62 = vpack.c.bf16 %v2054_v14, %v2050_v10 }
 0x20e   : > { %v2058_v17 = vpop.eup %2057  ;;  %2077 = vpow2.f32 %v1625_v13  ;;  %v1789_v18 = vpop.f32.mrb[40].mxu1  ;;  %v1200_v2 = vpack.c.bf16 %v2056_v16, %v2052_v12 }
 0x20f   : > { %v2060_v19 = vpop.eup %2059  ;;  %v1118_v20 = vadd.f32 1.0, %v2058_v17  ;;  %2079 = vpow2.f32 %v1623_v15  ;;  %v982_v22 = vadd.f32 %v1789_v18, %v2382_v21  ;;  %v973_v23 = vpop.f32.mrb[41].mxu1 }
 0x210   : > { %v2062_v24 = vpop.eup %2061  ;;  %v1116_v26 = vadd.f32 1.0, %v2060_v19  ;;  %v974_v25 = vadd.f32 %v2382_v21, %v973_v23  ;;  %v1790_v27 = vpop.f32.mrb[42].mxu1  ;;  %1819 = vmatprep.mubr.bf16.mxu0 %v1200_v2 }
 0x211   : > { %v2064_v29 = vpop.eup %2063  ;;  %2081 = vrcp.f32 %v1118_v20  ;;  %v1119_v31 = vadd.f32 1.0, %v2062_v24  ;;  %v1628_v28 = vmul.f32 -1.442695, %v982_v22  ;;  %v985_v35 = vadd.f32 %v1790_v27, %v2382_v21  ;;  %v976_v36 = vpop.f32.mrb[43].mxu1  ;;  %1820 = vmatmul.mubr.bf16.gmra.mrb[24].mxu0 %v1201_v62 }
 0x212   : > { %v2066_v37 = vpop.eup %2065  ;;  %2083 = vrcp.f32 %v1116_v26  ;;  %v1117_v39 = vadd.f32 1.0, %v2064_v29  ;;  %v1626_v58 = vmul.f32 -1.442695, %v974_v25  ;;  %v977_v33 = vadd.f32 %v2382_v21, %v976_v36 }
 0x213   : > { %v2068_v40 = vpop.eup %2067  ;;  %2085 = vrcp.f32 %v1119_v31  ;;  %v1629_v41 = vmul.f32 -1.442695, %v985_v35 }
 0x214   : > { %v2070_v42 = vpop.eup %2069  ;;  %2087 = vrcp.f32 %v1117_v39  ;;  %v1627_v43 = vmul.f32 -1.442695, %v977_v33 }
 0x215   : > { %v2072_v44 = vpop.eup %2071  ;;  %2089 = vpow2.f32 %v1628_v28  ;;  %v1203_v45 = vpack.c.bf16 %v2070_v42, %v2066_v37 }
 0x216   : > { %v2074_v46 = vpop.eup %2073  ;;  %2091 = vpow2.f32 %v1626_v58  ;;  %v1793_v47 = vpop.f32.mrb[44].mxu1  ;;  %v1202_v48 = vpack.c.bf16 %v2072_v44, %v2068_v40 }
 0x217   : > { %v2076_v49 = vpop.eup %2075  ;;  %v1122_v50 = vadd.f32 1.0, %v2074_v46  ;;  %2093 = vpow2.f32 %v1629_v41  ;;  %v998_v51 = vadd.f32 %v1793_v47, %v2382_v21  ;;  %v989_v30 = vpop.f32.mrb[45].mxu1 }
 0x218   : > { %v2078_v52 = vpop.eup %2077  ;;  %v1120_v53 = vadd.f32 1.0, %v2076_v49  ;;  %2095 = vpow2.f32 %v1627_v43  ;;  %v990_v54 = vadd.f32 %v2382_v21, %v989_v30  ;;  %v1794_v55 = vpop.f32.mrb[46].mxu1  ;;  %1823 = vmatprep.mubr.bf16.mxu0 %v1202_v48  ;;  %v2419_v43 = vld [vmem:[%s2533_s6] ss:$0 sm:$0xff] }
 0x219   : > { %v2080_v59 = vpop.eup %2079  ;;  %2097 = vrcp.f32 %v1122_v50  ;;  %v1123_v57 = vadd.f32 1.0, %v2078_v52  ;;  %v1632_v61 = vmul.f32 -1.442695, %v998_v51  ;;  %v1001_v63 = vadd.f32 %v1794_v55, %v2382_v21  ;;  %v992_v0 = vpop.f32.mrb[47].mxu1  ;;  %1824 = vmatmul.mubr.bf16.gmra.mrb[28].mxu0 %v1203_v45 }
 0x21a   : > { %2099 = vrcp.f32 %v1120_v53  ;;  %v1121_v32 = vadd.f32 1.0, %v2080_v59  ;;  %v1630_v1 = vmul.f32 -1.442695, %v990_v54  ;;  %v993_v3 = vadd.f32 %v2382_v21, %v992_v0 }
 0x21b   : > { %v2082_v4 = vpop.eup %2081  ;;  %2101 = vrcp.f32 %v1123_v57  ;;  %v1633_v34 = vmul.f32 -1.442695, %v1001_v63 }
 0x21c   : > { %v2084_v5 = vpop.eup %2083  ;;  %2103 = vrcp.f32 %v1121_v32  ;;  %v1631_v6 = vmul.f32 -1.442695, %v993_v3 }
 0x21d   : > { %v2086_v38 = vpop.eup %2085  ;;  %2105 = vpow2.f32 %v1632_v61 }
 0x21e   : > { %v2088_v7 = vpop.eup %2087  ;;  %2107 = vpow2.f32 %v1630_v1  ;;  %v1205_v8 = vpack.c.bf16 %v2086_v38, %v2082_v4 }
 0x21f   : > { %v2090_v9 = vpop.eup %2089  ;;  %2109 = vpow2.f32 %v1633_v34  ;;  %v1204_v56 = vpack.c.bf16 %v2088_v7, %v2084_v5 }
 0x220   : > { %v2092_v10 = vpop.eup %2091  ;;  %v1126_v11 = vadd.f32 1.0, %v2090_v9  ;;  %2111 = vpow2.f32 %v1631_v6 }
 0x221   : > { %v2094_v60 = vpop.eup %2093  ;;  %v1124_v12 = vadd.f32 1.0, %v2092_v10  ;;  %1827 = vmatprep.mubr.bf16.mxu0 %v1204_v56 }
 0x222   : > { %v2096_v21 = vpop.eup %2095  ;;  %2113 = vrcp.f32 %v1126_v11  ;;  %v1127_v13 = vadd.f32 1.0, %v2094_v60  ;;  %1828 = vmatmul.mubr.bf16.gmra.mrb[32].mxu0 %v1205_v8 }
 0x223   : > { %v2098_v14 = vpop.eup %2097  ;;  %2115 = vrcp.f32 %v1124_v12  ;;  %v1125_v15 = vadd.f32 1.0, %v2096_v21 }
 0x224   : > { %v2100_v16 = vpop.eup %2099  ;;  %2117 = vrcp.f32 %v1127_v13 }
 0x225   : > { %v2102_v62 = vpop.eup %2101  ;;  %2119 = vrcp.f32 %v1125_v15 }
 0x226   : > { %v2104_v17 = vpop.eup %2103  ;;  %v1207_v18 = vpack.c.bf16 %v2102_v62, %v2098_v14 }
 0x227   : > { %v2106_v2 = vpop.eup %2105  ;;  %v1206_v19 = vpack.c.bf16 %v2104_v17, %v2100_v16 }
 0x228   : > { %v2108_v20 = vpop.eup %2107  ;;  %v1130_v22 = vadd.f32 1.0, %v2106_v2 }
 0x229   : > { %v2110_v23 = vpop.eup %2109  ;;  %v1128_v24 = vadd.f32 1.0, %v2108_v20  ;;  %1831 = vmatprep.mubr.bf16.mxu0 %v1206_v19 }
 0x22a   : > { %v2112_v26 = vpop.eup %2111  ;;  %2121 = vrcp.f32 %v1130_v22  ;;  %v1131_v25 = vadd.f32 1.0, %v2110_v23  ;;  %1832 = vmatmul.mubr.bf16.gmra.mrb[36].mxu0 %v1207_v18 }
 0x22b   : > { %2123 = vrcp.f32 %v1128_v24  ;;  %v1129_v27 = vadd.f32 1.0, %v2112_v26 }
 0x22c   : > { %v2114_v29 = vpop.eup %2113  ;;  %2125 = vrcp.f32 %v1131_v25 }
 0x22d   : > { %v2116_v31 = vpop.eup %2115  ;;  %2127 = vrcp.f32 %v1129_v27 }
 0x22e   : > { %v2118_v28 = vpop.eup %2117 }
 0x22f   : > { %v2120_v35 = vpop.eup %2119  ;;  %v1209_v36 = vpack.c.bf16 %v2118_v28, %v2114_v29 }
 0x230   : > { %v1208_v37 = vpack.c.bf16 %v2120_v35, %v2116_v31 }
 0x232   : > { %1835 = vmatprep.mubr.bf16.mxu0 %v1208_v37 }
 0x233   : > { %1836 = vmatmul.mubr.bf16.gmra.mrb[40].mxu0 %v1209_v36 }
 0x234   : > { %v2122_v39 = vpop.eup %2121 }
 0x235   : > { %v2124_v58 = vpop.eup %2123 }
 0x236   : > { %v2126_v33 = vpop.eup %2125 }
 0x237   : > { %v2128_v40 = vpop.eup %2127  ;;  %v1211_v41 = vpack.c.bf16 %v2126_v33, %v2122_v39 }
 0x238   : > { %v1210_v42 = vpack.c.bf16 %v2128_v40, %v2124_v58 }
 0x23a   : > { %1839 = vmatprep.mubr.bf16.mxu0 %v1210_v42 }
 0x23b   : > { %1840 = vmatmul.mubr.bf16.gmra.mrb[44].mxu0 %v1211_v41 }
 0x2d3   : > { %v1813_v44 = vpop.f32.mrb[16].mxu0 }
 0x2d4   : > { %v1326_v45 = vadd.f32 %v1813_v44, %v2419_v43  ;;  %v1317_v46 = vpop.f32.mrb[17].mxu0 }
 0x2d5   : > { %v1318_v47 = vadd.f32 %v2419_v43, %v1317_v46  ;;  %v1814_v48 = vpop.f32.mrb[18].mxu0 }
 0x2d6   : > { %1447 = vst.msk [vmem:[%s2426_s12 + $0x10] sm:$0xff] %vm1444_vm1, %v1326_v45  ;;  %v1329_v49 = vadd.f32 %v1814_v48, %v2419_v43  ;;  %v1320_v50 = vpop.f32.mrb[19].mxu0 }
 0x2d7   : > { %1445 = vst.msk [vmem:[%s2426_s12] sm:$0xff] %vm1444_vm1, %v1318_v47  ;;  %v1321_v51 = vadd.f32 %v2419_v43, %v1320_v50 }
 0x2d8   : > { %1448 = vst.msk [vmem:[%s2426_s12 + $0x18] sm:$0xff] %vm1444_vm1, %v1329_v49 }
 0x2d9   : > { %1446 = vst.msk [vmem:[%s2426_s12 + $0x8] sm:$0xff] %vm1444_vm1, %v1321_v51 }
 0x2db   : > { %v1817_v30 = vpop.f32.mrb[20].mxu0 }
 0x2dc   : > { %v1342_v52 = vadd.f32 %v1817_v30, %v2419_v43  ;;  %v1333_v53 = vpop.f32.mrb[21].mxu0 }
 0x2dd   : > { %v1334_v54 = vadd.f32 %v2419_v43, %v1333_v53  ;;  %v1818_v55 = vpop.f32.mrb[22].mxu0 }
 0x2de   : > { %1451 = vst.msk [vmem:[%s2426_s12 + $0x30] sm:$0xff] %vm1444_vm1, %v1342_v52  ;;  %v1345_v59 = vadd.f32 %v1818_v55, %v2419_v43  ;;  %v1336_v57 = vpop.f32.mrb[23].mxu0 }
 0x2df   : > { %1449 = vst.msk [vmem:[%s2426_s12 + $0x20] sm:$0xff] %vm1444_vm1, %v1334_v54  ;;  %v1337_v61 = vadd.f32 %v2419_v43, %v1336_v57 }
 0x2e0   : > { %1452 = vst.msk [vmem:[%s2426_s12 + $0x38] sm:$0xff] %vm1444_vm1, %v1345_v59 }
 0x2e1   : > { %1450 = vst.msk [vmem:[%s2426_s12 + $0x28] sm:$0xff] %vm1444_vm1, %v1337_v61 }
 0x2e4   : > { %v1821_v63 = vpop.f32.mrb[24].mxu0 }
 0x2e5   : > { %v1358_v0 = vadd.f32 %v1821_v63, %v2419_v43  ;;  %v1349_v32 = vpop.f32.mrb[25].mxu0 }
 0x2e6   : > { %v1350_v1 = vadd.f32 %v2419_v43, %v1349_v32  ;;  %v1822_v3 = vpop.f32.mrb[26].mxu0 }
 0x2e7   : > { %1455 = vst.msk [vmem:[%s2426_s12 + $0x50] sm:$0xff] %vm1444_vm1, %v1358_v0  ;;  %v1361_v4 = vadd.f32 %v1822_v3, %v2419_v43  ;;  %v1352_v34 = vpop.f32.mrb[27].mxu0 }
 0x2e8   : > { %1453 = vst.msk [vmem:[%s2426_s12 + $0x40] sm:$0xff] %vm1444_vm1, %v1350_v1  ;;  %v1353_v5 = vadd.f32 %v2419_v43, %v1352_v34 }
 0x2e9   : > { %1456 = vst.msk [vmem:[%s2426_s12 + $0x58] sm:$0xff] %vm1444_vm1, %v1361_v4 }
 0x2ea   : > { %1454 = vst.msk [vmem:[%s2426_s12 + $0x48] sm:$0xff] %vm1444_vm1, %v1353_v5 }
 0x2ec   : > { %v1825_v6 = vpop.f32.mrb[28].mxu0 }
 0x2ed   : > { %v1374_v38 = vadd.f32 %v1825_v6, %v2419_v43  ;;  %v1365_v7 = vpop.f32.mrb[29].mxu0 }
 0x2ee   : > { %v1366_v8 = vadd.f32 %v2419_v43, %v1365_v7  ;;  %v1826_v9 = vpop.f32.mrb[30].mxu0 }
 0x2ef   : > { %1459 = vst.msk [vmem:[%s2426_s12 + $0x70] sm:$0xff] %vm1444_vm1, %v1374_v38  ;;  %v1377_v56 = vadd.f32 %v1826_v9, %v2419_v43  ;;  %v1368_v10 = vpop.f32.mrb[31].mxu0 }
 0x2f0   : > { %1457 = vst.msk [vmem:[%s2426_s12 + $0x60] sm:$0xff] %vm1444_vm1, %v1366_v8  ;;  %v1369_v11 = vadd.f32 %v2419_v43, %v1368_v10 }
 0x2f1   : > { %1460 = vst.msk [vmem:[%s2426_s12 + $0x78] sm:$0xff] %vm1444_vm1, %v1377_v56 }
 0x2f2   : > { %1458 = vst.msk [vmem:[%s2426_s12 + $0x68] sm:$0xff] %vm1444_vm1, %v1369_v11 }
 0x2f5   : > { %v1829_v60 = vpop.f32.mrb[32].mxu0 }
 0x2f6   : > { %v1390_v12 = vadd.f32 %v1829_v60, %v2419_v43  ;;  %v1381_v21 = vpop.f32.mrb[33].mxu0 }
 0x2f7   : > { %v1382_v13 = vadd.f32 %v2419_v43, %v1381_v21  ;;  %v1830_v14 = vpop.f32.mrb[34].mxu0 }
 0x2f8   : > { %1463 = vst.msk [vmem:[%s2426_s12 + $0x90] sm:$0xff] %vm1444_vm1, %v1390_v12  ;;  %v1393_v15 = vadd.f32 %v1830_v14, %v2419_v43  ;;  %v1384_v16 = vpop.f32.mrb[35].mxu0 }
 0x2f9   : > { %1461 = vst.msk [vmem:[%s2426_s12 + $0x80] sm:$0xff] %vm1444_vm1, %v1382_v13  ;;  %v1385_v62 = vadd.f32 %v2419_v43, %v1384_v16 }
 0x2fa   : > { %1464 = vst.msk [vmem:[%s2426_s12 + $0x98] sm:$0xff] %vm1444_vm1, %v1393_v15 }
 0x2fb   : > { %1462 = vst.msk [vmem:[%s2426_s12 + $0x88] sm:$0xff] %vm1444_vm1, %v1385_v62 }
 0x2fd   : > { %v1833_v17 = vpop.f32.mrb[36].mxu0 }
 0x2fe   : > { %v1406_v18 = vadd.f32 %v1833_v17, %v2419_v43  ;;  %v1397_v2 = vpop.f32.mrb[37].mxu0 }
 0x2ff   : > { %v1398_v19 = vadd.f32 %v2419_v43, %v1397_v2  ;;  %v1834_v20 = vpop.f32.mrb[38].mxu0 }
 0x300   : > { %1467 = vst.msk [vmem:[%s2426_s12 + $0xb0] sm:$0xff] %vm1444_vm1, %v1406_v18  ;;  %v1409_v22 = vadd.f32 %v1834_v20, %v2419_v43  ;;  %v1400_v23 = vpop.f32.mrb[39].mxu0 }
 0x301   : > { %1465 = vst.msk [vmem:[%s2426_s12 + $0xa0] sm:$0xff] %vm1444_vm1, %v1398_v19  ;;  %v1401_v24 = vadd.f32 %v2419_v43, %v1400_v23 }
 0x302   : > { %1468 = vst.msk [vmem:[%s2426_s12 + $0xb8] sm:$0xff] %vm1444_vm1, %v1409_v22 }
 0x303   : > { %1466 = vst.msk [vmem:[%s2426_s12 + $0xa8] sm:$0xff] %vm1444_vm1, %v1401_v24 }
 0x306   : > { %v1837_v26 = vpop.f32.mrb[40].mxu0 }
 0x307   : > { %v1422_v25 = vadd.f32 %v1837_v26, %v2419_v43  ;;  %v1413_v27 = vpop.f32.mrb[41].mxu0 }
 0x308   : > { %v1414_v29 = vadd.f32 %v2419_v43, %v1413_v27  ;;  %v1838_v31 = vpop.f32.mrb[42].mxu0 }
 0x309   : > { %1471 = vst.msk [vmem:[%s2426_s12 + $0xd0] sm:$0xff] %vm1444_vm1, %v1422_v25  ;;  %v1425_v28 = vadd.f32 %v1838_v31, %v2419_v43  ;;  %v1416_v35 = vpop.f32.mrb[43].mxu0 }
 0x30a   : > { %1469 = vst.msk [vmem:[%s2426_s12 + $0xc0] sm:$0xff] %vm1444_vm1, %v1414_v29  ;;  %v1417_v36 = vadd.f32 %v2419_v43, %v1416_v35 }
 0x30b   : > { %1472 = vst.msk [vmem:[%s2426_s12 + $0xd8] sm:$0xff] %vm1444_vm1, %v1425_v28 }
 0x30c   : > { %1470 = vst.msk [vmem:[%s2426_s12 + $0xc8] sm:$0xff] %vm1444_vm1, %v1417_v36 }
 0x30e   : > { %v1841_v37 = vpop.f32.mrb[44].mxu0 }
 0x30f   : > { %v1438_v39 = vadd.f32 %v1841_v37, %v2419_v43  ;;  %v1429_v58 = vpop.f32.mrb[45].mxu0 }
 0x310   : > { %v1430_v33 = vadd.f32 %v2419_v43, %v1429_v58  ;;  %v1842_v40 = vpop.f32.mrb[46].mxu0 }
 0x311   : > { %1475 = vst.msk [vmem:[%s2426_s12 + $0xf0] sm:$0xff] %vm1444_vm1, %v1438_v39  ;;  %v1441_v41 = vadd.f32 %v1842_v40, %v2419_v43  ;;  %v1432_v42 = vpop.f32.mrb[47].mxu0 }
 0x312   : > { %1473 = vst.msk [vmem:[%s2426_s12 + $0xe0] sm:$0xff] %vm1444_vm1, %v1430_v33  ;;  %v1433_v44 = vadd.f32 %v2419_v43, %v1432_v42 }
 0x313   : > { %1476 = vst.msk [vmem:[%s2426_s12 + $0xf8] sm:$0xff] %vm1444_vm1, %v1441_v41 }
 0x314   : > { %1474 = vst.msk [vmem:[%s2426_s12 + $0xe8] sm:$0xff] %vm1444_vm1, %v1433_v44 }
 0x315 PF: > { %s17_s24 = sadd.s32 1, %s2135_s24  }
 0x316   : > { %p14_p4 = scmp.ge.s32.totalorder %s17_s24, 4  }
 0x318   :  { %16 = sbr.rel (!%p14_p4) target bundleno = 1 (0x1), region = 78 }

</bundles_post_ra>
